<compile_context>
chip_gen: v5e
topology: v5e:2x2
jax: 0.10.0
libtpu: 0.0.40
codegen_flags: <defaults>
</compile_context>

<pallas_src>
import functools

import jax
import jax.numpy as jnp
from jax.experimental import pallas as pl
from jax.experimental.pallas import tpu as pltpu


def _round_up(v, m):
    return ((v + m - 1) // m) * m


def _triplet_kernel(x_ref, sqrow_ref, sqcol_ref, labrow_ref, labcol_ref, loss_ref,
                    *, margin, n, n_pad, block_m, cast_gram_bf16):
    i = pl.program_id(0)
    row0 = pl.multiple_of(i * block_m, block_m)

    x_all = x_ref[...]                               # (n_pad, d_pad), native dtype
    x_rows = x_ref[pl.ds(row0, block_m), :]          # (block_m, d_pad)
    if cast_gram_bf16:
        x_all = x_all.astype(jnp.bfloat16)
        x_rows = x_rows.astype(jnp.bfloat16)

    # Gram block on the MXU, f32 accumulation.
    gram = jax.lax.dot_general(
        x_rows, x_all, (((1,), (1,)), ((), ())),
        preferred_element_type=jnp.float32)          # (block_m, n_pad)

    sq_cols = sqrow_ref[...]                         # (1, n_pad)      f32
    sq_rows = sqcol_ref[...]                         # (block_m, 1)    f32
    lab_cols = labrow_ref[...]                       # (1, n_pad)      int32
    lab_rows = labcol_ref[...]                       # (block_m, 1)    int32

    # dist2[i, j] = sq_rows[i] + t[i, j]; the per-row constant commutes with
    # max/min, so reduce t and add sq_rows to the (block_m, 1) results only.
    t = sq_cols - 2.0 * gram                         # (block_m, n_pad)

    eq = lab_rows == lab_cols                        # (block_m, n_pad) bool
    if n_pad > n:
        col_valid = jax.lax.broadcasted_iota(jnp.int32, (1, n_pad), 1) < n
        pos_mask = jnp.logical_and(eq, col_valid)
        neg_mask = jnp.logical_and(jnp.logical_not(eq), col_valid)
    else:
        pos_mask = eq
        neg_mask = jnp.logical_not(eq)

    neg_inf = jnp.float32(-jnp.inf)
    pos_inf = jnp.float32(jnp.inf)
    eps = jnp.float32(1e-12)

    max_t = jnp.max(jnp.where(pos_mask, t, neg_inf), axis=1, keepdims=True)  # (bm,1)
    min_t = jnp.min(jnp.where(neg_mask, t, pos_inf), axis=1, keepdims=True)  # (bm,1)

    ap2 = sq_rows + max_t
    has_neg = jnp.isfinite(min_t)                    # False iff no valid negative
    an2 = sq_rows + jnp.where(has_neg, min_t, jnp.float32(0.0))

    # sqrt deferred to the two reduced vectors (2*block_m EUP ops, not n^2).
    dist_ap = jnp.sqrt(jnp.maximum(ap2, eps))
    dist_an = jnp.where(has_neg, jnp.sqrt(jnp.maximum(an2, eps)),
                        jnp.float32(margin))

    # MarginRankingLoss(dist_an, dist_ap, y=1): relu(ap - an + margin).
    losses = jnp.maximum(dist_ap - dist_an + jnp.float32(margin), jnp.float32(0.0))
    if n_pad > n:
        row_idx = row0 + jax.lax.broadcasted_iota(jnp.int32, (block_m, 1), 0)
        losses = jnp.where(row_idx < n, losses, jnp.float32(0.0))
    loss_ref[...] = losses


def triplet_loss(inputs, targets, margin=0.3, block_m=None, use_bf16_gram=False):
    """inputs: (n, d) features (f32 or bf16); targets: (n,) int labels. Returns scalar f32."""
    inputs = jnp.asarray(inputs)
    targets = jnp.asarray(targets)
    n, d = inputs.shape

    if block_m is None:
        block_m = 128                               # full M occupancy on v5e, fine on v6e/v7x
    block_m = _round_up(max(8, min(int(block_m), _round_up(n, 8))), 8)
    n_pad = _round_up(n, block_m)
    d_pad = _round_up(d, 128)

    x = inputs
    if (n_pad, d_pad) != (n, d):
        x = jnp.pad(x, ((0, n_pad - n), (0, d_pad - d)))   # zero rows/cols: distances unchanged
    labels = targets.astype(jnp.int32)
    if n_pad != n:
        labels = jnp.pad(labels, (0, n_pad - n))

    # Column-side squared norms computed once (f32 even for bf16 features).
    sq = jnp.sum(x.astype(jnp.float32) ** 2, axis=1)        # (n_pad,)
    sq_row = sq.reshape(1, n_pad)
    sq_col = sq.reshape(n_pad, 1)
    lab_row = labels.reshape(1, n_pad)
    lab_col = labels.reshape(n_pad, 1)

    cast_gram_bf16 = bool(use_bf16_gram) and x.dtype == jnp.float32

    kernel = functools.partial(
        _triplet_kernel, margin=float(margin), n=n, n_pad=n_pad,
        block_m=block_m, cast_gram_bf16=cast_gram_bf16)

    feat_bytes = n_pad * d_pad * x.dtype.itemsize            # single-buffered resident block
    vmem_limit = int(min(max(feat_bytes + 8 * block_m * n_pad * 4 + (2 << 20),
                             32 * 1024 * 1024),
                         128 * 1024 * 1024))
    cost = pl.CostEstimate(
        flops=2 * n_pad * n_pad * d_pad,
        transcendentals=2 * n_pad,
        bytes_accessed=feat_bytes + 16 * n_pad + 4 * n_pad)

    resident = dict(pipeline_mode=pl.Buffered(1))             # constant block index: 1 buffer
    losses = pl.pallas_call(
        kernel,
        out_shape=jax.ShapeDtypeStruct((n_pad, 1), jnp.float32),
        grid=(n_pad // block_m,),
        in_specs=[
            pl.BlockSpec((n_pad, d_pad), lambda i: (0, 0), **resident),   # features (resident)
            pl.BlockSpec((1, n_pad), lambda i: (0, 0), **resident),       # sq norms, row view
            pl.BlockSpec((block_m, 1), lambda i: (i, 0)),                 # sq norms, row-block col
            pl.BlockSpec((1, n_pad), lambda i: (0, 0), **resident),       # labels, row view
            pl.BlockSpec((block_m, 1), lambda i: (i, 0)),                 # labels, row-block col
        ],
        out_specs=pl.BlockSpec((block_m, 1), lambda i: (i, 0)),           # per-anchor losses
        compiler_params=pltpu.CompilerParams(
            dimension_semantics=("parallel",),                # disjoint output blocks per step
            vmem_limit_bytes=vmem_limit),
        cost_estimate=cost,
    )(x, sq_row, sq_col, lab_row, lab_col)

    return jnp.sum(losses) * jnp.float32(1.0 / n)


def _reference(inputs, targets, margin=0.3):
    # Pure-JAX reference mirroring the PyTorch module (high-precision Gram).
    x = inputs.astype(jnp.float32)
    sq = jnp.sum(x * x, axis=1, keepdims=True)
    gram = jax.lax.dot_general(x, x, (((1,), (1,)), ((), ())),
                               precision=jax.lax.Precision.HIGHEST,
                               preferred_element_type=jnp.float32)
    dist = jnp.sqrt(jnp.maximum(sq + sq.T - 2.0 * gram, 1e-12))
    mask = targets[:, None] == targets[None, :]
    ap = jnp.max(jnp.where(mask, dist, -jnp.inf), axis=1)
    an = jnp.min(jnp.where(mask, jnp.inf, dist), axis=1)
    an = jnp.where(jnp.isfinite(an), an, jnp.float32(margin))
    return jnp.mean(jnp.maximum(ap - an + margin, 0.0))


if __name__ == "__main__":
    key = jax.random.PRNGKey(0)
    k1, k2, k3, k4 = jax.random.split(key, 4)
    margin = 0.3

    # Case 1: module-sized example (batch 8, feat_dim 128, 4 ids x 2 images).
    n1, d1 = 8, 128
    x1 = jax.random.normal(k1, (n1, d1), dtype=jnp.float32)
    t1 = jnp.array([0, 0, 1, 1, 2, 2, 3, 3], dtype=jnp.int32)
    loss1 = jax.block_until_ready(triplet_loss(x1, t1, margin))
    ref1 = _reference(x1, t1, margin)
    assert jnp.allclose(loss1, ref1, rtol=1e-3, atol=1e-3), (loss1, ref1)

    # Case 2: multi-block grid path (batch 64, feat_dim 256, 8 ids x 8 images).
    n2, d2 = 64, 256
    x2 = jax.random.normal(k2, (n2, d2), dtype=jnp.float32)
    t2 = jnp.arange(n2, dtype=jnp.int32) // 8
    loss2 = jax.block_until_ready(triplet_loss(x2, t2, margin, block_m=16))
    ref2 = _reference(x2, t2, margin)
    assert jnp.allclose(loss2, ref2, rtol=1e-3, atol=1e-3), (loss2, ref2)

    # Case 3: padded rows and feature dim (n, d not multiples of the tile sizes).
    n3, d3 = 20, 96
    x3 = jax.random.normal(k3, (n3, d3), dtype=jnp.float32)
    t3 = jnp.arange(n3, dtype=jnp.int32) // 4
    loss3 = jax.block_until_ready(triplet_loss(x3, t3, margin, block_m=8))
    ref3 = _reference(x3, t3, margin)
    assert jnp.allclose(loss3, ref3, rtol=1e-3, atol=1e-3), (loss3, ref3)

    # Case 4: no-negative fallback (single identity -> dist_an = margin).
    t4 = jnp.zeros((n1,), dtype=jnp.int32)
    loss4 = jax.block_until_ready(triplet_loss(x1, t4, margin))
    ref4 = _reference(x1, t4, margin)
    assert jnp.allclose(loss4, ref4, rtol=1e-3, atol=1e-3), (loss4, ref4)

    # Case 5: bf16 feature path and bf16-Gram option for f32 inputs (smoke checks;
    # hard-mining argmax/argmin can flip under reduced precision, so no tight assert).
    x5 = jax.random.normal(k4, (32, 128), dtype=jnp.bfloat16)
    t5 = jnp.arange(32, dtype=jnp.int32) // 4
    loss5 = jax.block_until_ready(triplet_loss(x5, t5, margin))
    assert bool(jnp.isfinite(loss5))
    loss6 = jax.block_until_ready(triplet_loss(x2, t2, margin, use_bf16_gram=True))
    assert bool(jnp.isfinite(loss6))

    print("KERNEL_OK")
</pallas_src>

<mosaic_0001>
module attributes {stable_mosaic.version = 11 : i64} {
  func.func @_triplet_kernel(%arg0: i32, %arg1: memref<8x128xf32, #tpu.memory_space<vmem>>, %arg2: memref<1x8xf32, #tpu.memory_space<vmem>>, %arg3: memref<8x1xf32, #tpu.memory_space<vmem>>, %arg4: memref<1x8xi32, #tpu.memory_space<vmem>>, %arg5: memref<8x1xi32, #tpu.memory_space<vmem>>, %arg6: memref<8x1xf32, #tpu.memory_space<vmem>>) attributes {dimension_semantics = [#tpu.dimension_semantics<parallel>], iteration_bounds = array<i64: 1>, scalar_prefetch = 0 : i64, scratch_operands = 0 : i64, tpu.core_type = #tpu.core_type<tc>, window_params = [{pipeline_mode = #tpu.pipeline_mode<synchronous>, transform_indices = @transform_0, window_bounds = array<i64: 8, 128>}, {pipeline_mode = #tpu.pipeline_mode<synchronous>, transform_indices = @transform_1, window_bounds = array<i64: 1, 8>}, {transform_indices = @transform_2, window_bounds = array<i64: 8, 1>}, {pipeline_mode = #tpu.pipeline_mode<synchronous>, transform_indices = @transform_3, window_bounds = array<i64: 1, 8>}, {transform_indices = @transform_4, window_bounds = array<i64: 8, 1>}, {transform_indices = @transform_5, window_bounds = array<i64: 8, 1>}]} {
    %c8_i32 = arith.constant 8 : i32
    %0 = arith.muli %arg0, %c8_i32 : i32
    %1 = tpu.assume_multiple %0, 8 : i32
    %c0 = arith.constant 0 : index
    %c0_0 = arith.constant 0 : index
    %2 = vector.load %arg1[%c0, %c0_0] : memref<8x128xf32, #tpu.memory_space<vmem>>, vector<8x128xf32>
    %3 = arith.index_cast %1 : i32 to index
    %c0_1 = arith.constant 0 : index
    %4 = vector.load %arg1[%3, %c0_1] : memref<8x128xf32, #tpu.memory_space<vmem>>, vector<8x128xf32>
    %cst = arith.constant dense<0.000000e+00> : vector<8x8xf32>
    %5 = tpu.matmul %4, %2, %cst {dimension_numbers = #tpu.dot_dimension_numbers<[1], [1], [0], [0], [0, 0, 1, 0], [], []>} : vector<8x128xf32>, vector<8x128xf32>, vector<8x8xf32> -> vector<8x8xf32>
    %c0_2 = arith.constant 0 : index
    %c0_3 = arith.constant 0 : index
    %6 = vector.load %arg2[%c0_2, %c0_3] : memref<1x8xf32, #tpu.memory_space<vmem>>, vector<1x8xf32>
    %c0_4 = arith.constant 0 : index
    %c0_5 = arith.constant 0 : index
    %7 = vector.load %arg3[%c0_4, %c0_5] : memref<8x1xf32, #tpu.memory_space<vmem>>, vector<8x1xf32>
    %c0_6 = arith.constant 0 : index
    %c0_7 = arith.constant 0 : index
    %8 = vector.load %arg4[%c0_6, %c0_7] : memref<1x8xi32, #tpu.memory_space<vmem>>, vector<1x8xi32>
    %c0_8 = arith.constant 0 : index
    %c0_9 = arith.constant 0 : index
    %9 = vector.load %arg5[%c0_8, %c0_9] : memref<8x1xi32, #tpu.memory_space<vmem>>, vector<8x1xi32>
    %cst_10 = arith.constant 2.000000e+00 : f32
    %10 = vector.broadcast %cst_10 : f32 to vector<8x8xf32>
    %11 = arith.mulf %10, %5 : vector<8x8xf32>
    %12 = vector.broadcast %6 : vector<1x8xf32> to vector<8x8xf32>
    %13 = arith.subf %12, %11 : vector<8x8xf32>
    %14 = vector.broadcast %9 : vector<8x1xi32> to vector<8x8xi32>
    %15 = vector.broadcast %8 : vector<1x8xi32> to vector<8x8xi32>
    %16 = arith.cmpi eq, %14, %15 : vector<8x8xi32>
    %cst_11 = arith.constant dense<true> : vector<8x8xi1>
    %17 = arith.xori %16, %cst_11 : vector<8x8xi1>
    %cst_12 = arith.constant 0xFF800000 : f32
    %18 = vector.broadcast %cst_12 : f32 to vector<8x8xf32>
    %19 = arith.select %16, %13, %18 : vector<8x8xi1>, vector<8x8xf32>
    %cst_13 = arith.constant dense<0xFF800000> : vector<8xf32>
    %20 = vector.multi_reduction <maximumf>, %19, %cst_13 [1] : vector<8x8xf32> to vector<8xf32>
    %21 = vector.shape_cast %20 : vector<8xf32> to vector<8x1xf32>
    %cst_14 = arith.constant 0x7F800000 : f32
    %22 = vector.broadcast %cst_14 : f32 to vector<8x8xf32>
    %23 = arith.select %17, %13, %22 : vector<8x8xi1>, vector<8x8xf32>
    %cst_15 = arith.constant dense<0x7F800000> : vector<8xf32>
    %24 = vector.multi_reduction <minimumf>, %23, %cst_15 [1] : vector<8x8xf32> to vector<8xf32>
    %25 = vector.shape_cast %24 : vector<8xf32> to vector<8x1xf32>
    %26 = arith.addf %7, %21 : vector<8x1xf32>
    %27 = tpu.weird %25 : vector<8x1xf32> -> vector<8x1xi1>
    %cst_16 = arith.constant dense<true> : vector<8x1xi1>
    %28 = arith.xori %27, %cst_16 : vector<8x1xi1>
    %cst_17 = arith.constant 0.000000e+00 : f32
    %29 = vector.broadcast %cst_17 : f32 to vector<8x1xf32>
    %30 = arith.select %28, %25, %29 : vector<8x1xi1>, vector<8x1xf32>
    %31 = arith.addf %7, %30 : vector<8x1xf32>
    %cst_18 = arith.constant 9.99999996E-13 : f32
    %32 = vector.broadcast %cst_18 : f32 to vector<8x1xf32>
    %33 = arith.maximumf %26, %32 : vector<8x1xf32>
    %34 = math.sqrt %33 : vector<8x1xf32>
    %cst_19 = arith.constant 9.99999996E-13 : f32
    %35 = vector.broadcast %cst_19 : f32 to vector<8x1xf32>
    %36 = arith.maximumf %31, %35 : vector<8x1xf32>
    %37 = math.sqrt %36 : vector<8x1xf32>
    %cst_20 = arith.constant 3.000000e-01 : f32
    %38 = vector.broadcast %cst_20 : f32 to vector<8x1xf32>
    %39 = arith.select %28, %37, %38 : vector<8x1xi1>, vector<8x1xf32>
    %40 = arith.subf %34, %39 : vector<8x1xf32>
    %cst_21 = arith.constant 3.000000e-01 : f32
    %41 = vector.broadcast %cst_21 : f32 to vector<8x1xf32>
    %42 = arith.addf %40, %41 : vector<8x1xf32>
    %cst_22 = arith.constant 0.000000e+00 : f32
    %43 = vector.broadcast %cst_22 : f32 to vector<8x1xf32>
    %44 = arith.maximumf %42, %43 : vector<8x1xf32>
    %c0_23 = arith.constant 0 : index
    %c0_24 = arith.constant 0 : index
    %45 = vector.load %arg6[%c0_23, %c0_24] : memref<8x1xf32, #tpu.memory_space<vmem>>, vector<8x1xf32>
    tpu.vector_store %arg6[%c0_23, %c0_24], %44 {strides = array<i32>} : memref<8x1xf32, #tpu.memory_space<vmem>>, vector<8x1xf32>,
    return
  }
  func.func @transform_0(%arg0: i32) -> (i32, i32) {
    %c0_i32 = arith.constant 0 : i32
    %c0_i32_0 = arith.constant 0 : i32
    %c0_i32_1 = arith.constant 0 : i32
    return %c0_i32, %c0_i32_0 : i32, i32
  }
  func.func @transform_1(%arg0: i32) -> (i32, i32) {
    %c0_i32 = arith.constant 0 : i32
    %c0_i32_0 = arith.constant 0 : i32
    %c0_i32_1 = arith.constant 0 : i32
    return %c0_i32, %c0_i32_0 : i32, i32
  }
  func.func @transform_2(%arg0: i32) -> (i32, i32) {
    %c0_i32 = arith.constant 0 : i32
    %c0_i32_0 = arith.constant 0 : i32
    return %arg0, %c0_i32 : i32, i32
  }
  func.func @transform_3(%arg0: i32) -> (i32, i32) {
    %c0_i32 = arith.constant 0 : i32
    %c0_i32_0 = arith.constant 0 : i32
    %c0_i32_1 = arith.constant 0 : i32
    return %c0_i32, %c0_i32_0 : i32, i32
  }
  func.func @transform_4(%arg0: i32) -> (i32, i32) {
    %c0_i32 = arith.constant 0 : i32
    %c0_i32_0 = arith.constant 0 : i32
    return %arg0, %c0_i32 : i32, i32
  }
  func.func @transform_5(%arg0: i32) -> (i32, i32) {
    %c0_i32 = arith.constant 0 : i32
    %c0_i32_0 = arith.constant 0 : i32
    return %arg0, %c0_i32 : i32, i32
  }
}

</mosaic_0001>

<bundles_post_ra>
// kernel: tpu_custom_call.1
= control target key start
LH: loop header
LB: loop body
LE: loop exit
PB: predicated region body
PF: predicated region fallthrough
CT: control target
= control target key end

     0   :  { %v118_v1 = vmov 0   ;;  %vm119_vm1 = vmmov 1   ;;  %vm60_vm3 = vcmask 64512   ;;  %vm103_vm10 = vcmask 7168   ;;  %s178_s0 = inlined_call_operand.vmem [shape: f32[8,128], index: 0, kind: input, shape index: {}]   ;;  %s179_s4 = inlined_call_operand.vmem [shape: s32[8,1], index: 4, kind: input, shape index: {}]   ;;  %s180_s1 = inlined_call_operand.vmem [shape: f32[1,8], index: 1, kind: input, shape index: {}]   ;;  %s181_s3 = inlined_call_operand.vmem [shape: s32[1,8], index: 3, kind: input, shape index: {}]   ;;  %s182_s2 = inlined_call_operand.vmem [shape: f32[8,1], index: 2, kind: input, shape index: {}]   ;;  %s183_s5 = inlined_call_operand.vmem [shape: f32[8,1], index: 5, kind: output, shape index: {}]  }
   0x1   :  { %v21_v0 = vld [vmem:[%s178_s0] sm:$0xff]  ;;  %111 = vset.pattern.permute.xlu0 %v118_v1 }
   0x2   :  { %v47_v2 = vld [vmem:[%s179_s4] sm:$0xff]  ;;  %39 = vmatpush.xpose.msra.mxu0 %v21_v0 }
   0x3   :  { %54 = vperm.xlu0 %111, %v47_v2   ;;  %v113_v3 = vld [vmem:[%s181_s3] ss:$0 sm:$0xff] }
   0x4   :  { %v112_v5 = vld [vmem:[%s180_s1] ss:$0 sm:$0xff] }
   0x5   :  { %40 = vmatmul.f32.vlgmr.msra.gmra.mxu0 %v21_v0  ;;  %v45_v13 = vld [vmem:[%s182_s2] sm:$0xff] }
  0x75   :  { %v55_v4 = vpop.permute.xlu0 %54 }
  0x76   :  { %vm57_vm0 = vcmp.eq.s32.totalorder %v55_v4, %v113_v3 }
  0x77   :  { %vm58_vm2 = vmxor %vm57_vm0, %vm119_vm1 }
  0x82   :  { %v41_v6 = vpop.f32.mrf.mxu0 }
  0x83   :  { %v48_v7 = vmul.f32 2.0, %v41_v6 }
  0x85   :  { %v52_v8 = vsub.f32 %v112_v5, %v48_v7 }
  0x87   :  { %v64_v9 = vsel %vm58_vm2, %v52_v8, inf  ;;  %v59_v10 = vsel %vm57_vm0, %v52_v8, -inf }
  0x88   :  { %v65_v11 = vsel %vm60_vm3, %v64_v9, inf  ;;  %v61_v12 = vsel %vm60_vm3, %v59_v10, -inf }
  0x89   :  { %66 = vmin.xlane.f32.xlu0 %v65_v11  ;;  %62 = vmax.xlane.f32.xlu1 %v61_v12 }
  0xfc   :  { %v67_v14 = vpop.xlane.xlu0 %66  ;;  %v63_v15 = vpop.xlane.xlu1 %62 }
  0xfd   :  { %vm69_vm4 = vweird.f32 %v67_v14  ;;  %v68_v16 = vadd.f32 %v63_v15, %v45_v13 }
  0xfe   :  { %vm167_vm5 = vmxor %vm69_vm4, %vm119_vm1 }
  0xff   :  { %v71_v18 = vsel %vm167_vm5, %v67_v14, 0.0  ;;  %v73_v19 = vmax.f32 %v68_v16, 1e-12 }
 0x100   :  { %v72_v20 = vadd.f32 %v71_v18, %v45_v13 }
 0x101   :  { %114 = vrsqrt.f32 %v73_v19  ;;  %vm81_vm6 = vcmp.eq.f32.partialorder %v73_v19, inf  ;;  %v84_v39 = vand.u32 2147483648, %v73_v19  ;;  %vm83_vm9 = vcmp.eq.f32.partialorder %v73_v19, 0.0 }
 0x102   :  { %v86_v21 = vmax.f32 %v72_v20, 1e-12 }
 0x104   :  { %116 = vrsqrt.f32 %v86_v21  ;;  %vm94_vm7 = vcmp.eq.f32.partialorder %v86_v21, inf  ;;  %v97_v36 = vand.u32 2147483648, %v86_v21  ;;  %vm96_vm8 = vcmp.eq.f32.partialorder %v86_v21, 0.0 }
 0x107   :  { %v115_v22 = vpop.eup %114 }
 0x108   :  { %v75_v23 = vmul.f32 %v115_v22, %v73_v19 }
 0x10a   :  { %v117_v24 = vpop.eup %116  ;;  %v76_v25 = vmul.f32 %v115_v22, %v75_v23 }
 0x10b   :  { %v88_v26 = vmul.f32 %v117_v24, %v86_v21 }
 0x10c   :  { %v77_v27 = vmul.f32 0.5, %v76_v25 }
 0x10d   :  { %v89_v28 = vmul.f32 %v117_v24, %v88_v26 }
 0x10e   :  { %v78_v29 = vsub.f32 1.5, %v77_v27 }
 0x10f   :  { %v90_v30 = vmul.f32 0.5, %v89_v28 }
 0x110   :  { %v79_v31 = vmul.f32 %v115_v22, %v78_v29 }
 0x111   :  { %v91_v32 = vsub.f32 1.5, %v90_v30 }
 0x112   :  { %v80_v33 = vmul.f32 %v79_v31, %v73_v19 }
 0x113   :  { %v92_v34 = vmul.f32 %v117_v24, %v91_v32 }
 0x114   :  { %v82_v37 = vsel %vm81_vm6, %v73_v19, %v80_v33 }
 0x115   :  { %v93_v35 = vmul.f32 %v92_v34, %v86_v21  ;;  %v85_v42 = vsel %vm83_vm9, %v84_v39, %v82_v37 }
 0x117   :  { %v95_v38 = vsel %vm94_vm7, %v86_v21, %v93_v35 }
 0x118   :  { %v98_v40 = vsel %vm96_vm8, %v97_v36, %v95_v38 }
 0x119   :  { %v99_v41 = vsel %vm167_vm5, %v98_v40, 0.3 }
 0x11a   :  { %v100_v43 = vsub.f32 %v85_v42, %v99_v41 }
 0x11c   :  { %v101_v44 = vadd.f32 0.3, %v100_v43 }
 0x11e   :  { %v102_v45 = vmax.f32 %v101_v44, 0.0 }
 0x120   :  { %104 = vst.msk [vmem:[%s183_s5] sm:$0xff] %vm103_vm10, %v102_v45 }

</bundles_post_ra>
